<compile_context>
chip_gen: v7x
topology: tpu7x:2x2x1
jax: 0.10.0
libtpu: 0.0.40
codegen_flags: <defaults>
</compile_context>

<pallas_src>
import jax
import jax.numpy as jnp
from jax import lax
from jax.experimental import pallas as pl
from jax.experimental.pallas import tpu as pltpu


def attn_pool_kernel(x_ref, w_ref, c_ref, o_ref):
    # x_ref: (BT, T, H) block of BT batch elements
    # w_ref: (H, H) nn.Linear weight, (out, in) layout (full, resident)
    # c_ref: (1, H) context row (full, resident)
    # o_ref: (BT, H) output block
    bt, t, h = x_ref.shape
    x = x_ref[...]                                            # (BT, T, H)

    # linear(x) = x @ W.T : contract x's H against the weight's *second* axis
    # (no host-side transpose). Flatten BT*T so the MXU gets a tall M.
    s = lax.dot_general(
        x.reshape(bt * t, h), w_ref[...],
        dimension_numbers=(((1,), (1,)), ((), ())),
        preferred_element_type=jnp.float32)                   # (BT*T, H) f32
    # Note: tanh of BT*T*H elements runs on the single EUP; this is often the
    # binding unit for moderate H (keep other EUP work minimal).
    s = jnp.tanh(s).reshape(bt, t, h)                         # (BT, T, H) f32

    # scores[b, t] = sum_h s[b,t,h] * context[h]  -> VPU mul + lane reduce
    # (an N=1 MXU matvec would waste >99% of the MXU columns).
    scores = jnp.sum(s * c_ref[...].astype(jnp.float32),
                     axis=-1, keepdims=True)                  # (BT, T, 1)

    # Numerically-stable softmax over T; normalization is deferred to the end.
    m = jnp.max(scores, axis=1, keepdims=True)                # (BT, 1, 1)
    e = jnp.exp(scores - m)                                   # (BT, T, 1)
    denom = jnp.sum(e, axis=1, keepdims=True)                 # (BT, 1, 1)

    # Unnormalized pooled vector: VPU multiply + sublane reduce (T is small for
    # pooling workloads; for very long T route this through the MXU instead and
    # tile T with an online-softmax accumulator).
    pooled = jnp.sum(e * x.astype(jnp.float32), axis=1)       # (BT, H) f32

    # Normalize once on the (BT, H) row; approx reciprocal runs on the EUP slot.
    inv = pl.reciprocal(denom[:, 0, :], approx=True)          # (BT, 1)
    o_ref[...] = (pooled * inv).astype(o_ref.dtype)           # (BT, H)


def attention_pool(x, weight, context, *, block_b=8):
    """x: (B, T, H); weight: (H, H) torch nn.Linear (out, in) layout; context: (H,)."""
    B, T, H = x.shape
    BT = min(block_b, B)                       # batch elements per grid step
    B_pad = pl.cdiv(B, BT) * BT
    if B_pad != B:
        # Zero-padded rows produce a uniform softmax over zeros (finite, no NaN)
        # and are sliced off below.
        x = jnp.pad(x, ((0, B_pad - B), (0, 0), (0, 0)))
    c = context.reshape(1, H)

    out = pl.pallas_call(
        attn_pool_kernel,
        out_shape=jax.ShapeDtypeStruct((B_pad, H), x.dtype),
        grid_spec=pltpu.PrefetchScalarGridSpec(
            num_scalar_prefetch=0,
            grid=(B_pad // BT,),
            in_specs=[
                pl.BlockSpec((BT, T, H), lambda b: (b, 0, 0)),  # x: BT batch rows / step
                # Weight / context blocks are identical every step; for very
                # large H (v7x, 64 MiB VMEM) store the weight in bf16 and/or
                # single-buffer it (pipeline_mode=pl.Buffered(1)) and raise
                # vmem_limit_bytes. Unnecessary at these sizes.
                pl.BlockSpec((H, H), lambda b: (0, 0)),
                pl.BlockSpec((1, H), lambda b: (0, 0)),
            ],
            out_specs=pl.BlockSpec((BT, H), lambda b: (b, 0)),   # lane-dense (last dim = H)
        ),
        compiler_params=pltpu.CompilerParams(
            dimension_semantics=("parallel",)),
    )(x, weight, c)
    return out[:B] if B_pad != B else out


def attention_pool_ref(x, weight, context):
    s = jnp.tanh(jnp.einsum("bth,oh->bto", x, weight))
    scores = jnp.einsum("bth,h->bt", s, context)
    w = jax.nn.softmax(scores, axis=1)[..., None]
    return jnp.sum(w * x, axis=1)


if __name__ == "__main__":
    B, T, H = 2, 8, 32
    key = jax.random.PRNGKey(0)
    kx, kw, kc = jax.random.split(key, 3)

    x = jax.random.normal(kx, (B, T, H), dtype=jnp.float32)
    # shapes match nn.Linear(H, H, bias=False) weight + context parameter
    weight = jax.random.normal(kw, (H, H), dtype=jnp.float32) * 0.1
    context = jax.random.normal(kc, (H,), dtype=jnp.float32)

    out = attention_pool(x, weight, context)
    jax.block_until_ready(out)

    ref = attention_pool_ref(x, weight, context)
    assert out.shape == (B, H)
    # tolerance accounts for the approx (EUP) reciprocal in the softmax normalization
    assert jnp.allclose(out, ref, atol=2e-3, rtol=2e-3), "mismatch vs reference"

    print("KERNEL_OK")
</pallas_src>

<mosaic_0001>
module attributes {stable_mosaic.version = 11 : i64} {
  func.func @attn_pool_kernel(%arg0: i32, %arg1: memref<2x8x32xf32, #tpu.memory_space<vmem>>, %arg2: memref<32x32xf32, #tpu.memory_space<vmem>>, %arg3: memref<1x32xf32, #tpu.memory_space<vmem>>, %arg4: memref<2x32xf32, #tpu.memory_space<vmem>>) attributes {dimension_semantics = [#tpu.dimension_semantics<parallel>], iteration_bounds = array<i64: 1>, scalar_prefetch = 0 : i64, scratch_operands = 0 : i64, tpu.core_type = #tpu.core_type<tc>, window_params = [{transform_indices = @transform_0, window_bounds = array<i64: 2, 8, 32>}, {pipeline_mode = #tpu.pipeline_mode<synchronous>, transform_indices = @transform_1, window_bounds = array<i64: 32, 32>}, {pipeline_mode = #tpu.pipeline_mode<synchronous>, transform_indices = @transform_2, window_bounds = array<i64: 1, 32>}, {transform_indices = @transform_3, window_bounds = array<i64: 2, 32>}]} {
    %c0 = arith.constant 0 : index
    %c0_0 = arith.constant 0 : index
    %c0_1 = arith.constant 0 : index
    %0 = vector.load %arg1[%c0, %c0_0, %c0_1] : memref<2x8x32xf32, #tpu.memory_space<vmem>>, vector<2x8x32xf32>
    %1 = vector.shape_cast %0 : vector<2x8x32xf32> to vector<16x32xf32>
    %c0_2 = arith.constant 0 : index
    %c0_3 = arith.constant 0 : index
    %2 = vector.load %arg2[%c0_2, %c0_3] : memref<32x32xf32, #tpu.memory_space<vmem>>, vector<32x32xf32>
    %cst = arith.constant dense<0.000000e+00> : vector<16x32xf32>
    %3 = tpu.matmul %1, %2, %cst {dimension_numbers = #tpu.dot_dimension_numbers<[1], [1], [0], [0], [0, 0, 1, 0], [], []>} : vector<16x32xf32>, vector<32x32xf32>, vector<16x32xf32> -> vector<16x32xf32>
    %4 = math.tanh %3 : vector<16x32xf32>
    %5 = vector.shape_cast %4 : vector<16x32xf32> to vector<2x8x32xf32>
    %c0_4 = arith.constant 0 : index
    %c0_5 = arith.constant 0 : index
    %6 = vector.load %arg3[%c0_4, %c0_5] : memref<1x32xf32, #tpu.memory_space<vmem>>, vector<1x32xf32>
    %7 = vector.shape_cast %6 : vector<1x32xf32> to vector<1x1x32xf32>
    %8 = vector.broadcast %7 : vector<1x1x32xf32> to vector<2x8x32xf32>
    %9 = arith.mulf %5, %8 : vector<2x8x32xf32>
    %cst_6 = arith.constant dense<0.000000e+00> : vector<2x8xf32>
    %10 = vector.multi_reduction <add>, %9, %cst_6 [2] : vector<2x8x32xf32> to vector<2x8xf32>
    %11 = vector.shape_cast %10 : vector<2x8xf32> to vector<2x8x1xf32>
    %cst_7 = arith.constant dense<0xFF800000> : vector<2x1xf32>
    %12 = vector.multi_reduction <maximumf>, %11, %cst_7 [1] : vector<2x8x1xf32> to vector<2x1xf32>
    %13 = vector.shape_cast %12 : vector<2x1xf32> to vector<2x1x1xf32>
    %14 = vector.broadcast %13 : vector<2x1x1xf32> to vector<2x8x1xf32>
    %15 = arith.subf %11, %14 : vector<2x8x1xf32>
    %16 = math.exp %15 : vector<2x8x1xf32>
    %cst_8 = arith.constant dense<0.000000e+00> : vector<2x1xf32>
    %17 = vector.multi_reduction <add>, %16, %cst_8 [1] : vector<2x8x1xf32> to vector<2x1xf32>
    %18 = vector.shape_cast %17 : vector<2x1xf32> to vector<2x1x1xf32>
    %19 = vector.broadcast %16 : vector<2x8x1xf32> to vector<2x8x32xf32>
    %20 = arith.mulf %19, %0 : vector<2x8x32xf32>
    %cst_9 = arith.constant dense<0.000000e+00> : vector<2x32xf32>
    %21 = vector.multi_reduction <add>, %20, %cst_9 [1] : vector<2x8x32xf32> to vector<2x32xf32>
    %22 = vector.shape_cast %18 : vector<2x1x1xf32> to vector<2x1xf32>
    %23 = tpu.reciprocal %22 {approx = true} : vector<2x1xf32> -> vector<2x1xf32>
    %24 = vector.broadcast %23 : vector<2x1xf32> to vector<2x32xf32>
    %25 = arith.mulf %21, %24 : vector<2x32xf32>
    %c0_10 = arith.constant 0 : index
    %c0_11 = arith.constant 0 : index
    %26 = vector.load %arg4[%c0_10, %c0_11] : memref<2x32xf32, #tpu.memory_space<vmem>>, vector<2x32xf32>
    tpu.vector_store %arg4[%c0_10, %c0_11], %25 {strides = array<i32>} : memref<2x32xf32, #tpu.memory_space<vmem>>, vector<2x32xf32>,
    return
  }
  func.func @transform_0(%arg0: i32) -> (i32, i32, i32) {
    %c0_i32 = arith.constant 0 : i32
    %c0_i32_0 = arith.constant 0 : i32
    %c0_i32_1 = arith.constant 0 : i32
    return %arg0, %c0_i32, %c0_i32_0 : i32, i32, i32
  }
  func.func @transform_1(%arg0: i32) -> (i32, i32) {
    %c0_i32 = arith.constant 0 : i32
    %c0_i32_0 = arith.constant 0 : i32
    %c0_i32_1 = arith.constant 0 : i32
    return %c0_i32, %c0_i32_0 : i32, i32
  }
  func.func @transform_2(%arg0: i32) -> (i32, i32) {
    %c0_i32 = arith.constant 0 : i32
    %c0_i32_0 = arith.constant 0 : i32
    %c0_i32_1 = arith.constant 0 : i32
    return %c0_i32, %c0_i32_0 : i32, i32
  }
  func.func @transform_3(%arg0: i32) -> (i32, i32) {
    %c0_i32 = arith.constant 0 : i32
    %c0_i32_0 = arith.constant 0 : i32
    return %arg0, %c0_i32 : i32, i32
  }
}

</mosaic_0001>

<bundles_post_ra>
// kernel: tpu_custom_call.1
= control target key start
LH: loop header
LB: loop body
LE: loop exit
PB: predicated region body
PF: predicated region fallthrough
CT: control target
= control target key end

     0   :  { %8 = vsyncpa [#allocation3], 0  ;;  %s430_s0 = inlined_call_operand.hbm [shape: f32[2,8,32], index: 0, kind: input, shape index: {}]   ;;  %s431_s1 = inlined_call_operand.hbm [shape: f32[32,32], index: 1, kind: input, shape index: {}]   ;;  %s432_s2 = inlined_call_operand.vmem [shape: f32[1,32], index: 2, kind: input, shape index: {}]   ;;  %s433_s3 = inlined_call_operand.hbm [shape: f32[2,32], index: 3, kind: output, shape index: {}]  }
   0x1   :  { %9 = vsyncpa [#allocation6], 0 }
   0x2   :  { %10 = vsyncpa [#allocation4], 0  ;;  %s358_s12 = smov [#allocation2]   ;;  %s286_s16 = scalar_lea.hbm %s430_s0, 256 }
   0x3   :  { %s16_s13 = sshll.u32 %s358_s12, 4  ;;  %p287_p0 = scmp.ne.s32.totalorder %s430_s0, %s286_s16  ;;  %s17_s13 = int_to_ptr.vmem [resolvable:$true] %s16_s13 }
   0x4   :  { %p290_p1 = scmp.lt.u32.totalorder %s286_s16, %s430_s0 }
   0x6   :  { %p292_p2 = pnand %p290_p1, %p287_p0 }
   0x8   :  { %295 = shalt.err (!%p292_p2)
}
   0x9   :  { %s296_s21 = scalar_lea.vmem %s17_s13, 256  ;;  %p301_p4 = scmp.lt.s32.totalorder %s17_s13, %s17_s13 }
   0xa   :  { %p297_p3 = scmp.ne.s32.totalorder %s17_s13, %s296_s21  ;;  %p302_p5 = scmp.lt.s32.totalorder %s296_s21, %s296_s21 }
   0xc   :  { %p303_p6 = por %p302_p5, %p301_p4 }
   0xe   :  { %p304_p7 = pnand %p303_p6, %p297_p3 }
  0x10   :  { %307 = shalt.err (!%p304_p7)
}
  0x11   :  { %s359_s22 = smov 128   ;;  %s360_s23 = smov 8  }
  0x12   :  { %22 = dma.hbm_to_vmem [thread:$0]  %s430_s0, 256, %s17_s13, [#allocation3], %s359_s22, %s359_s22, %s360_s23  }
  0x13   :  { %s361_s26 = smov [#allocation5]   ;;  %s308_s30 = scalar_lea.hbm %s431_s1, 512 }
  0x14   :  { %s28_s27 = sshll.u32 %s361_s26, 4  ;;  %p309_p8 = scmp.ne.s32.totalorder %s431_s1, %s308_s30  ;;  %s29_s27 = int_to_ptr.vmem [resolvable:$true] %s28_s27 }
  0x15   :  { %p312_p9 = scmp.lt.u32.totalorder %s308_s30, %s431_s1 }
  0x17   :  { %p314_p10 = pnand %p312_p9, %p309_p8 }
  0x19   :  { %317 = shalt.err (!%p314_p10)
}
  0x1a   :  { %s318_s8 = scalar_lea.vmem %s29_s27, 512  ;;  %p323_p12 = scmp.lt.s32.totalorder %s29_s27, %s29_s27 }
  0x1b   :  { %p319_p11 = scmp.ne.s32.totalorder %s29_s27, %s318_s8  ;;  %p324_p13 = scmp.lt.s32.totalorder %s318_s8, %s318_s8 }
  0x1d   :  { %p325_p0 = por %p324_p13, %p323_p12 }
  0x1f   :  { %p326_p1 = pnand %p325_p0, %p319_p11 }
  0x21   :  { %329 = shalt.err (!%p326_p1)
}
  0x22   :  { %34 = dma.hbm_to_vmem [thread:$0]  %s431_s1, 512, %s29_s27, [#allocation6], %s359_s22, %s359_s22, %s360_s23  }
  0x23   :  { %352 = dma.done.wait [#allocation3], 256  }
  0x24   :  { %353 = vsyncadd [#allocation3], 4294967040 }
  0x25   :  { %354 = dma.done.wait [#allocation6], 512  }
  0x26   :  { %355 = vsyncadd [#allocation6], 4294966784  ;;  %vm49_vm0 = vcmask 261120   ;;  %v45_v0 = vld [vmem:[#allocation5] sm:$0xff]  ;;  %v46_v1 = vld [vmem:[#allocation5 + $0x8] sm:$0xff]  ;;  %vm212_vm2 = vcmask 1041409  }
  0x27   :  { %vm258_vm1 = vmpackc.low %vm49_vm0, %vm49_vm0  ;;  %v47_v2 = vld [vmem:[#allocation5 + $0x10] sm:$0xff]  ;;  %v257_v3 = vpack.c.bf16 %v46_v1, %v45_v0  ;;  %v48_v4 = vld [vmem:[#allocation5 + $0x18] sm:$0xff]  ;;  %vm215_vm3 = vcmask 254976  }
  0x28   :  { %v43_v5 = vld [vmem:[#allocation2] sm:$0xff]  ;;  %v263_v6 = vpack.c.bf16 %v48_v4, %v47_v2  ;;  %v44_v7 = vld [vmem:[#allocation2 + $0x8] sm:$0xff] }
  0x29   :  { %254 = vmatprep.mubr.msk.f32.mxu0 %vm49_vm0, %v43_v5  ;;  %259 = vmatprep.subr.msk.bf16.mxu0 %vm258_vm1, %v257_v3  ;;  %v239_v10 = vld [vmem:[%s432_s2] ss:$0 sm:$0xff]  ;;  %s362_s2 = smov [#allocation7]  }
  0x2a   :  { %262 = vmatpush3.bf16.xpose.msk.msra.mxu0 %vm258_vm1, %v257_v3  ;;  %s223_s11 = sshll.u32 %s362_s2, 4  ;;  %s224_s11 = int_to_ptr.vmem [resolvable:$true] %s223_s11 }
  0x2b   :  { %265 = vmatprep.subr.msk.bf16.mxu0 %vm258_vm1, %v263_v6  ;;  %s330_s12 = scalar_lea.vmem %s224_s11, 32  ;;  %p335_p3 = scmp.lt.s32.totalorder %s224_s11, %s224_s11 }
  0x2c   :  { %p331_p2 = scmp.ne.s32.totalorder %s224_s11, %s330_s12  ;;  %p336_p4 = scmp.lt.s32.totalorder %s330_s12, %s330_s12 }
  0x2e   :  { %p337_p5 = por %p336_p4, %p335_p3 }
  0x30   :  { %p338_p6 = pnand %p337_p5, %p331_p2 }
  0x32   :  { %268 = vmatpush3.bf16.xpose.msk.msra.mxu0 %vm258_vm1, %v263_v6 }
  0x39   :  { %255 = vmatmul.mubr.msk.f32.vlgmr.msra.gmra.mrb[0].mxu0 %vm49_vm0, %v44_v7 }
 0x10c   :  { %v256_v8 = vpop.f32.mrb[0].mxu0 }
 0x10d   :  { %274 = vtanh.f32 %v256_v8  ;;  %v134_v9 = vpop.f32.mrb[1].mxu0 }
 0x10e   :  { %276 = vtanh.f32 %v134_v9 }
 0x117   :  { %v275_v11 = vpop.eup %274 }
 0x118   :  { %v277_v12 = vpop.eup %276  ;;  %v153_v15 = vmul.f32 %v275_v11, %v239_v10 }
 0x119   :  { %v152_v13 = vmul.f32 %v277_v12, %v239_v10 }
 0x11a   :  { %v157_v16 = vsel %vm49_vm0, %v153_v15, 0.0 }
 0x11b   :  { %v154_v14 = vsel %vm49_vm0, %v152_v13, 0.0 }
 0x11c   :  { %155 = vadd.xlane.f32.xlu0 %v154_v14 }
 0x120   :  { %158 = vadd.xlane.f32.xlu0 %v157_v16 }
 0x1a9   :  { %v156_v17 = vpop.xlane.xlu0 %155 }
 0x1aa   :  { %v160_v18 = vrot.slane %v156_v17, 4 }
 0x1ac   :  { %v161_v19 = vmax.f32 %v156_v17, %v160_v18 }
 0x1ad   :  { %v159_v20 = vpop.xlane.xlu0 %158 }
 0x1ae   :  { %v162_v21 = vrot.slane %v161_v19, 2  ;;  %v166_v22 = vrot.slane %v159_v20, 4 }
 0x1b0   :  { %v163_v23 = vmax.f32 %v161_v19, %v162_v21  ;;  %v167_v24 = vmax.f32 %v159_v20, %v166_v22 }
 0x1b2   :  { %v164_v25 = vrot.slane %v163_v23, 1  ;;  %v168_v26 = vrot.slane %v167_v24, 2 }
 0x1b4   :  { %v165_v27 = vmax.f32 %v163_v23, %v164_v25  ;;  %v169_v28 = vmax.f32 %v167_v24, %v168_v26 }
 0x1b6   :  { %v172_v29 = vsub.f32 %v156_v17, %v165_v27  ;;  %v170_v30 = vrot.slane %v169_v28, 1 }
 0x1b8   :  { %v174_v31 = vmul.f32 1.442695, %v172_v29  ;;  %v171_v32 = vmax.f32 %v169_v28, %v170_v30 }
 0x1ba   :  { %278 = vpow2.f32 %v174_v31  ;;  %v173_v33 = vsub.f32 %v159_v20, %v171_v32 }
 0x1bc   :  { %v176_v34 = vmul.f32 1.442695, %v173_v33 }
 0x1be   :  { %280 = vpow2.f32 %v176_v34 }
 0x1c4   :  { %v279_v35 = vpop.eup %278 }
 0x1c5   :  { %v178_v36 = vrot.slane %v279_v35, 4  ;;  %v190_v37 = vmul.f32 %v279_v35, %v43_v5 }
 0x1c7   :  { %v179_v38 = vadd.f32 %v279_v35, %v178_v36  ;;  %v192_v39 = vsel %vm49_vm0, %v190_v37, 0.0 }
 0x1c8   :  { %v281_v40 = vpop.eup %280  ;;  %v193_v44 = vrot.slane %v192_v39, 4 }
 0x1c9   :  { %v180_v41 = vrot.slane %v179_v38, 2  ;;  %v184_v42 = vrot.slane %v281_v40, 4  ;;  %v191_v43 = vmul.f32 %v281_v40, %v44_v7 }
 0x1ca   :  { %v194_v51 = vadd.f32 %v193_v44, %v192_v39 }
 0x1cb   :  { %v181_v45 = vadd.f32 %v180_v41, %v179_v38  ;;  %v185_v46 = vadd.f32 %v281_v40, %v184_v42  ;;  %v199_v47 = vsel %vm49_vm0, %v191_v43, 0.0 }
 0x1cc   :  { %v200_v48 = vrot.slane %v199_v47, 4  ;;  %v195_v56 = vrot.slane %v194_v51, 2 }
 0x1cd   :  { %v182_v49 = vrot.slane %v181_v45, 1  ;;  %v186_v50 = vrot.slane %v185_v46, 2 }
 0x1ce   :  { %v201_v52 = vadd.f32 %v200_v48, %v199_v47  ;;  %v196_v59 = vadd.f32 %v195_v56, %v194_v51 }
 0x1cf   :  { %v183_v53 = vadd.f32 %v182_v49, %v181_v45  ;;  %v187_v54 = vadd.f32 %v186_v50, %v185_v46 }
 0x1d0   :  { %v202_v57 = vrot.slane %v201_v52, 2  ;;  %v197_v61 = vrot.slane %v196_v59, 1 }
 0x1d1   :  { %v188_v55 = vrot.slane %v187_v54, 1  ;;  %282 = vrcp.f32 %v183_v53 }
 0x1d2   :  { %v203_v60 = vadd.f32 %v202_v57, %v201_v52  ;;  %v198_v0 = vadd.f32 %v197_v61, %v196_v59 }
 0x1d3   :  { %v189_v58 = vadd.f32 %v188_v55, %v187_v54 }
 0x1d4   :  { %v204_v62 = vrot.slane %v203_v60, 1 }
 0x1d5   :  { %284 = vrcp.f32 %v189_v58 }
 0x1d6   :  { %v205_v1 = vadd.f32 %v204_v62, %v203_v60 }
 0x1db   :  { %v283_v63 = vpop.eup %282 }
 0x1dc   :  { %v208_v3 = vmul.f32 %v283_v63, %v198_v0 }
 0x1df   :  { %v285_v2 = vpop.eup %284 }
 0x1e0   :  { %v209_v4 = vmul.f32 %v285_v2, %v205_v1 }
 0x1e2   :  { %v213_v5 = vsel %vm212_vm2, %v209_v4, %v208_v3 }
 0x1e3   :  { %216 = vst.msk [vmem:[#allocation7] sm:$0x3] %vm215_vm3, %v213_v5 }
 0x1e4   :  { %341 = shalt.err (!%p338_p6)
}
 0x1e5   :  { %s342_s15 = scalar_lea.hbm %s433_s3, 32 }
 0x1e6   :  { %p343_p7 = scmp.ne.s32.totalorder %s433_s3, %s342_s15  ;;  %p346_p8 = scmp.lt.u32.totalorder %s342_s15, %s433_s3 }
 0x1e8   :  { %p348_p9 = pnand %p346_p8, %p343_p7 }
 0x1ea   :  { %351 = shalt.err (!%p348_p9)
}
 0x1eb   :  { %226 = dma.vmem_to_hbm [thread:$0]  %s224_s11, 32, %s433_s3, [#allocation4]  }
 0x1ec   :  { %356 = dma.done.wait [#allocation4], 32  }
 0x1ed   :  { %357 = vsyncadd [#allocation4], 4294967264 }
 0x1ee   :  { %230 = vsyncpa [#allocation3], 1 }
 0x1ef   :  { %231 = vsyncpa [#allocation6], 1 }
 0x1f0   :  { %232 = vsyncpa [#allocation4], 1 }

</bundles_post_ra>
